<compile_context>
chip_gen: v5e
topology: v5e:2x2
jax: 0.10.0
libtpu: 0.0.40
codegen_flags: <defaults>
</compile_context>

<pallas_src>
import functools

import jax
import jax.numpy as jnp
from jax.experimental import pallas as pl
from jax.experimental.pallas import tpu as pltpu


def _myloss_kernel(pred_ref, lab_ref, o_ref, acc_ref, *,
                   total_rows, block_rows, blocks_per_core, need_mask):
    p = pl.program_id(0)
    k = pl.program_id(1)

    # Zero this core's partial accumulator at the start of its reduction.
    @pl.when(k == 0)
    def _():
        acc_ref[...] = jnp.zeros_like(acc_ref)

    pred = pred_ref[...].astype(jnp.float32)
    lab = lab_ref[...].astype(jnp.float32)

    d = pred - lab
    per_elem = jnp.where(lab >= 1.0, d * d,
                         jnp.where(lab == 0.0, jnp.abs(pred), 0.0))

    if need_mask:
        gstart = (p * blocks_per_core + k) * block_rows
        rows_left = total_rows - gstart

        @pl.when(rows_left >= block_rows)        # full block: no mask ops
        def _():
            acc_ref[...] += jnp.sum(per_elem, axis=0, keepdims=True)

        @pl.when(rows_left < block_rows)         # ragged / duplicated block
        def _():
            row_ids = jax.lax.broadcasted_iota(jnp.int32, per_elem.shape, 0)
            masked = jnp.where(row_ids < rows_left, per_elem, 0.0)  # select,
            # not multiply, so NaN/Inf padding garbage cannot leak in.
            acc_ref[...] += jnp.sum(masked, axis=0, keepdims=True)
    else:
        acc_ref[...] += jnp.sum(per_elem, axis=0, keepdims=True)

    # Emit this core's (1, C) partial once, on its last reduction step.
    @pl.when(k == pl.num_programs(1) - 1)
    def _():
        o_ref[...] = acc_ref[...]


def _as_rows_lanes(x):
    """Flatten to a lane-dense (rows, C) view (reshape only, no copy)."""
    t = x.size
    for c in (512, 1024, 256, 128):
        if t % c == 0:
            return x.reshape(t // c, c)
    # Ragged total element count: keep the caller's trailing dim on the lanes.
    # TODO(synk): add a second grid axis over C for huge non-128-divisible N.
    if x.ndim >= 2:
        return x.reshape(-1, x.shape[-1])
    return x.reshape(1, -1)


def myloss_forward(predicted_scores, labels, *,
                   block_budget_bytes=2 * 1024 * 1024, num_core_splits=2):
    """Fused MyLoss forward. Accepts any shape / narrow dtypes."""
    assert predicted_scores.shape == labels.shape
    if predicted_scores.size == 0:
        return jnp.float32(0.0)

    x = _as_rows_lanes(predicted_scores)
    y = _as_rows_lanes(labels)
    R, C = x.shape

    # Sublane multiple for packed dtypes: 8 (f32), 16 (bf16), 32 (int8).
    min_itemsize = min(x.dtype.itemsize, y.dtype.itemsize)
    max_itemsize = max(x.dtype.itemsize, y.dtype.itemsize)
    sub = max(8, 32 // min_itemsize)

    # Byte-bounded tile: one input block <= block_budget_bytes.
    rows = block_budget_bytes // max(1, C * max_itemsize)
    rows = max((rows // sub) * sub, sub)
    block_rows = R if rows >= R else rows

    nblocks = pl.cdiv(R, block_rows)
    # Leading parallel axis: two TensorCores on v7x each take half the blocks.
    P = max(1, num_core_splits) if nblocks >= 2 else 1
    K = pl.cdiv(nblocks, P)
    need_mask = (P * K * block_rows) != R

    def in_index_map(p, k):
        # Clamp over-provisioned (p, k) slots onto the last block; their
        # contribution is zeroed by the in-kernel row mask.
        return (jnp.minimum(p * K + k, nblocks - 1), 0)

    kernel = functools.partial(
        _myloss_kernel,
        total_rows=R,
        block_rows=block_rows,
        blocks_per_core=K,
        need_mask=need_mask,
    )

    in_spec = pl.BlockSpec((block_rows, C), in_index_map)

    partials = pl.pallas_call(
        kernel,
        out_shape=jax.ShapeDtypeStruct((P, 1, C), jnp.float32),
        grid=(P, K),
        in_specs=[in_spec, in_spec],
        out_specs=pl.BlockSpec((None, 1, C), lambda p, k: (p, 0, 0)),
        scratch_shapes=[pltpu.VMEM((1, C), jnp.float32)],
        compiler_params=pltpu.CompilerParams(
            dimension_semantics=("parallel", "arbitrary")),
    )(x, y)

    # Tiny final reduction over per-core, per-lane partials (P * C f32).
    return jnp.sum(partials)


def reference_loss(predicted_scores, labels):
    zero_scores = jnp.where(labels == 0, predicted_scores, labels)
    one_scores = jnp.where(labels >= 1, predicted_scores, labels)
    ret = (one_scores - labels) ** 2 + jnp.abs(zero_scores - labels)
    return jnp.sum(ret)


if __name__ == "__main__":
    key = jax.random.PRNGKey(0)
    kp, kl = jax.random.split(key)

    # Case 1: f32, tiny tile budget -> 2 blocks, dual-core split, ragged mask.
    B, N = 20, 384
    pred = jax.random.normal(kp, (B, N), jnp.float32)
    labels = jax.random.randint(kl, (B, N), 0, 3).astype(jnp.float32)
    ref = reference_loss(pred, labels)

    loss_small = jax.block_until_ready(
        myloss_forward(pred, labels, block_budget_bytes=8 * 512 * 4))
    assert jnp.allclose(loss_small, ref, rtol=1e-4, atol=1e-3), (loss_small, ref)

    # Case 2: default byte-bounded tiling (single lane-dense block, no mask).
    loss_default = jax.block_until_ready(myloss_forward(pred, labels))
    assert jnp.allclose(loss_default, ref, rtol=1e-4, atol=1e-3), (loss_default, ref)

    # Case 3: odd shape whose element count is not 128-divisible (fallback).
    k3p, k3l = jax.random.split(jax.random.PRNGKey(1))
    pred3 = jax.random.normal(k3p, (3, 7, 37), jnp.float32)
    labels3 = jax.random.randint(k3l, (3, 7, 37), 0, 3).astype(jnp.float32)
    ref3 = reference_loss(pred3, labels3)
    loss3 = jax.block_until_ready(myloss_forward(pred3, labels3))
    assert jnp.allclose(loss3, ref3, rtol=1e-4, atol=1e-3), (loss3, ref3)

    # Case 4: bf16 inputs streamed natively, 4 blocks -> P=2, K=2, no mask.
    k4p, k4l = jax.random.split(jax.random.PRNGKey(2))
    pred4 = jax.random.normal(k4p, (256, 128), jnp.float32)
    labels4 = jax.random.randint(k4l, (256, 128), 0, 3).astype(jnp.float32)
    ref4 = reference_loss(pred4.astype(jnp.bfloat16).astype(jnp.float32), labels4)
    loss4 = jax.block_until_ready(
        myloss_forward(pred4.astype(jnp.bfloat16), labels4.astype(jnp.bfloat16),
                       block_budget_bytes=16 * 512 * 2))
    assert jnp.allclose(loss4, ref4, rtol=2e-3, atol=1e-2), (loss4, ref4)

    print("KERNEL_OK")
</pallas_src>

<mosaic_0001>
module attributes {stable_mosaic.version = 11 : i64} {
  func.func @_myloss_kernel(%arg0: i32, %arg1: i32, %arg2: memref<8x512xf32, #tpu.memory_space<vmem>>, %arg3: memref<8x512xf32, #tpu.memory_space<vmem>>, %arg4: memref<1x1x512xf32, #tpu.memory_space<vmem>>, %arg5: memref<1x512xf32, #tpu.memory_space<vmem>>) attributes {dimension_semantics = [#tpu.dimension_semantics<parallel>, #tpu.dimension_semantics<arbitrary>], iteration_bounds = array<i64: 2, 1>, scalar_prefetch = 0 : i64, scratch_operands = 1 : i64, tpu.core_type = #tpu.core_type<tc>, window_params = [{transform_indices = @transform_0, window_bounds = array<i64: 8, 512>}, {transform_indices = @transform_1, window_bounds = array<i64: 8, 512>}, {transform_indices = @transform_2, window_bounds = array<i64: 1, 1, 512>}]} {
    %c0_i32 = arith.constant 0 : i32
    %0 = arith.cmpi eq, %arg1, %c0_i32 : i32
    %1 = arith.extui %0 : i1 to i32
    %c0_i32_0 = arith.constant 0 : i32
    %2 = arith.cmpi ne, %1, %c0_i32_0 : i32
    scf.if %2 {
      %cst_12 = arith.constant 0.000000e+00 : f32
      %28 = vector.broadcast %cst_12 : f32 to vector<1x512xf32>
      %c0_13 = arith.constant 0 : index
      %c0_14 = arith.constant 0 : index
      %29 = vector.load %arg5[%c0_13, %c0_14] : memref<1x512xf32, #tpu.memory_space<vmem>>, vector<1x512xf32>
      tpu.vector_store %arg5[%c0_13, %c0_14], %28 {strides = array<i32>} : memref<1x512xf32, #tpu.memory_space<vmem>>, vector<1x512xf32>,
    } else {
    }
    %c0 = arith.constant 0 : index
    %c0_1 = arith.constant 0 : index
    %3 = vector.load %arg2[%c0, %c0_1] : memref<8x512xf32, #tpu.memory_space<vmem>>, vector<8x512xf32>
    %c0_2 = arith.constant 0 : index
    %c0_3 = arith.constant 0 : index
    %4 = vector.load %arg3[%c0_2, %c0_3] : memref<8x512xf32, #tpu.memory_space<vmem>>, vector<8x512xf32>
    %5 = arith.subf %3, %4 : vector<8x512xf32>
    %cst = arith.constant 1.000000e+00 : f32
    %6 = vector.broadcast %cst : f32 to vector<8x512xf32>
    %7 = arith.cmpf oge, %4, %6 : vector<8x512xf32>
    %8 = arith.mulf %5, %5 : vector<8x512xf32>
    %cst_4 = arith.constant 0.000000e+00 : f32
    %9 = vector.broadcast %cst_4 : f32 to vector<8x512xf32>
    %10 = arith.cmpf oeq, %4, %9 : vector<8x512xf32>
    %11 = math.absf %3 : vector<8x512xf32>
    %cst_5 = arith.constant 0.000000e+00 : f32
    %12 = vector.broadcast %cst_5 : f32 to vector<8x512xf32>
    %13 = arith.select %10, %11, %12 : vector<8x512xi1>, vector<8x512xf32>
    %14 = arith.select %7, %8, %13 : vector<8x512xi1>, vector<8x512xf32>
    %c1_i32 = arith.constant 1 : i32
    %15 = arith.muli %arg0, %c1_i32 : i32
    %16 = arith.addi %15, %arg1 : i32
    %c8_i32 = arith.constant 8 : i32
    %17 = arith.muli %16, %c8_i32 : i32
    %c15_i32 = arith.constant 15 : i32
    %18 = arith.subi %c15_i32, %17 : i32
    %c8_i32_6 = arith.constant 8 : i32
    %19 = arith.cmpi sge, %18, %c8_i32_6 : i32
    %20 = arith.extui %19 : i1 to i32
    %c0_i32_7 = arith.constant 0 : i32
    %21 = arith.cmpi ne, %20, %c0_i32_7 : i32
    scf.if %21 {
      %c0_12 = arith.constant 0 : index
      %c0_13 = arith.constant 0 : index
      %28 = vector.load %arg5[%c0_12, %c0_13] : memref<1x512xf32, #tpu.memory_space<vmem>>, vector<1x512xf32>
      %cst_14 = arith.constant dense<0.000000e+00> : vector<512xf32>
      %29 = vector.multi_reduction <add>, %14, %cst_14 [0] : vector<8x512xf32> to vector<512xf32>
      %30 = vector.shape_cast %29 : vector<512xf32> to vector<1x512xf32>
      %31 = arith.addf %28, %30 : vector<1x512xf32>
      %c0_15 = arith.constant 0 : index
      %c0_16 = arith.constant 0 : index
      %32 = vector.load %arg5[%c0_15, %c0_16] : memref<1x512xf32, #tpu.memory_space<vmem>>, vector<1x512xf32>
      tpu.vector_store %arg5[%c0_15, %c0_16], %31 {strides = array<i32>} : memref<1x512xf32, #tpu.memory_space<vmem>>, vector<1x512xf32>,
    } else {
    }
    %c8_i32_8 = arith.constant 8 : i32
    %22 = arith.cmpi slt, %18, %c8_i32_8 : i32
    %23 = arith.extui %22 : i1 to i32
    %c0_i32_9 = arith.constant 0 : i32
    %24 = arith.cmpi ne, %23, %c0_i32_9 : i32
    scf.if %24 {
      %28 = tpu.iota {dimensions = array<i32: 0>} : vector<8x512xi32>
      %29 = vector.broadcast %18 : i32 to vector<8x512xi32>
      %30 = arith.cmpi slt, %28, %29 : vector<8x512xi32>
      %cst_12 = arith.constant 0.000000e+00 : f32
      %31 = vector.broadcast %cst_12 : f32 to vector<8x512xf32>
      %32 = arith.select %30, %14, %31 : vector<8x512xi1>, vector<8x512xf32>
      %c0_13 = arith.constant 0 : index
      %c0_14 = arith.constant 0 : index
      %33 = vector.load %arg5[%c0_13, %c0_14] : memref<1x512xf32, #tpu.memory_space<vmem>>, vector<1x512xf32>
      %cst_15 = arith.constant dense<0.000000e+00> : vector<512xf32>
      %34 = vector.multi_reduction <add>, %32, %cst_15 [0] : vector<8x512xf32> to vector<512xf32>
      %35 = vector.shape_cast %34 : vector<512xf32> to vector<1x512xf32>
      %36 = arith.addf %33, %35 : vector<1x512xf32>
      %c0_16 = arith.constant 0 : index
      %c0_17 = arith.constant 0 : index
      %37 = vector.load %arg5[%c0_16, %c0_17] : memref<1x512xf32, #tpu.memory_space<vmem>>, vector<1x512xf32>
      tpu.vector_store %arg5[%c0_16, %c0_17], %36 {strides = array<i32>} : memref<1x512xf32, #tpu.memory_space<vmem>>, vector<1x512xf32>,
    } else {
    }
    %c0_i32_10 = arith.constant 0 : i32
    %25 = arith.cmpi eq, %arg1, %c0_i32_10 : i32
    %26 = arith.extui %25 : i1 to i32
    %c0_i32_11 = arith.constant 0 : i32
    %27 = arith.cmpi ne, %26, %c0_i32_11 : i32
    scf.if %27 {
      %c0_12 = arith.constant 0 : index
      %c0_13 = arith.constant 0 : index
      %28 = vector.load %arg5[%c0_12, %c0_13] : memref<1x512xf32, #tpu.memory_space<vmem>>, vector<1x512xf32>
      %c0_14 = arith.constant 0 : index
      %c0_15 = arith.constant 0 : index
      %c0_16 = arith.constant 0 : index
      %29 = vector.load %arg4[%c0_14, %c0_15, %c0_16] : memref<1x1x512xf32, #tpu.memory_space<vmem>>, vector<1x1x512xf32>
      %30 = vector.shape_cast %29 : vector<1x1x512xf32> to vector<1x512xf32>
      %31 = vector.shape_cast %28 : vector<1x512xf32> to vector<1x1x512xf32>
      tpu.vector_store %arg4[%c0_14, %c0_15, %c0_16], %31 {strides = array<i32>} : memref<1x1x512xf32, #tpu.memory_space<vmem>>, vector<1x1x512xf32>,
    } else {
    }
    return
  }
  func.func @transform_0(%arg0: i32, %arg1: i32) -> (i32, i32) {
    %c1_i32 = arith.constant 1 : i32
    %0 = arith.muli %arg0, %c1_i32 : i32
    %1 = arith.addi %0, %arg1 : i32
    %c1_i32_0 = arith.constant 1 : i32
    %2 = arith.minsi %1, %c1_i32_0 : i32
    %c0_i32 = arith.constant 0 : i32
    %c0_i32_1 = arith.constant 0 : i32
    return %2, %c0_i32 : i32, i32
  }
  func.func @transform_1(%arg0: i32, %arg1: i32) -> (i32, i32) {
    %c1_i32 = arith.constant 1 : i32
    %0 = arith.muli %arg0, %c1_i32 : i32
    %1 = arith.addi %0, %arg1 : i32
    %c1_i32_0 = arith.constant 1 : i32
    %2 = arith.minsi %1, %c1_i32_0 : i32
    %c0_i32 = arith.constant 0 : i32
    %c0_i32_1 = arith.constant 0 : i32
    return %2, %c0_i32 : i32, i32
  }
  func.func @transform_2(%arg0: i32, %arg1: i32) -> (i32, i32, i32) {
    %c0_i32 = arith.constant 0 : i32
    %c0_i32_0 = arith.constant 0 : i32
    %c0_i32_1 = arith.constant 0 : i32
    return %arg0, %c0_i32, %c0_i32_0 : i32, i32, i32
  }
}

</mosaic_0001>

<bundles_post_ra>
// kernel: tpu_custom_call.1
= control target key start
LH: loop header
LB: loop body
LE: loop exit
PB: predicated region body
PF: predicated region fallthrough
CT: control target
= control target key end

     0   :  { %s1015_s0 = inlined_call_operand.hbm [shape: f32[15,512], index: 0, kind: input, shape index: {}]   ;;  %s1016_s1 = inlined_call_operand.hbm [shape: f32[15,512], index: 1, kind: input, shape index: {}]   ;;  %s1017_s2 = inlined_call_operand.hbm [shape: f32[2,1,512], index: 2, kind: output, shape index: {}]  }
   0x1   :  { %1020 = sst [smem:[#allocation14_spill]] %s1015_s0 }
   0x2   :  { %7 = vsyncpa [#allocation4], 0 }
   0x3   :  { %9 = vsyncpa [#allocation4 + $0x1], 0 }
   0x4   :  { %10 = vsyncpa [#allocation7], 0 }
   0x5   :  { %12 = vsyncpa [#allocation7 + $0x1], 0 }
   0x6   :  { %13 = vsyncpa [#allocation5], 0 }
   0x7   :  { %15 = vsyncpa [#allocation5 + $0x1], 0  ;;  %s821_s9 = smov 0   ;;  %s823_s10 = smov 0  }
   0x8   :  { %s825_s11 = smov 0   ;;  %s827_s12 = smov 0  }
   0x9   :  { %s829_s13 = smov 0   ;;  %s831_s14 = smov 0  }
   0xa   :  { %s833_s15 = smov 0   ;;  %s835_s16 = smov 0  }
   0xb   :  { %s837_s17 = smov 0  }
   0xc LB: > { %1021 = sst [smem:[#allocation12_spill]] %s799_s16  ;;  %s518_s18 = sadd.s32 4294967295, %s803_s17   ;;  %s803_s17 = sphi %s837_s17, %s21_s17   ;;  %s799_s16 = sphi %s835_s16, %s1031_s16   ;;  %s795_s15 = sphi %s833_s15, %s1030_s15   ;;  %s791_s14 = sphi %s831_s14, %s1037_s14   ;;  %s787_s13 = sphi %s829_s13, %s1036_s13   ;;  %s783_s12 = sphi %s827_s12, %s1035_s12   ;;  %s779_s11 = sphi %s825_s11, %s1034_s11   ;;  %s775_s10 = sphi %s823_s10, %s1033_s10   ;;  %s771_s9 = sphi %s821_s9, %s1032_s9  }
   0xd   : > { %s519_s19 = sadd.s32 4294967294, %s803_s17   ;;  %s33_s20 = sadd.s32 1, %s799_s16 }
   0xe   : > { %p38_p0 = scmp.lt.s32.totalorder %s799_s16, 1  ;;  %p35_p1 = scmp.ge.s32.totalorder %s33_s20, 2 }
   0xf   : > { %s46_s21 = sadd.s32 1, %s791_s14  ;;  %p53_p2 = scmp.ne.s32.totalorder %s791_s14, %s787_s13 }
  0x10   : > { %s870_s22 = scalar_select %p38_p0, %s799_s16, 1 }
  0x11   : > { %s1039_s20 = smov (%p35_p1, %s33_s20), 0  ;;  %p54_p3 = scmp.eq.s32.totalorder %s803_s17, 0 }
  0x12   : > { %1022 = sst [smem:[#allocation13_spill]] %s1039_s20  ;;  %p41_p4 = scmp.lt.s32.totalorder %s1039_s20, 1 }
  0x13   : > { %p59_p5 = scmp.ne.s32.totalorder %s787_s13, %s783_s12  ;;  %p879_p6 = por %p54_p3, %p53_p2 }
  0x14   : > { %p60_p7 = scmp.eq.s32.totalorder %s518_s18, 0  ;;  %s101_s26 = ssub.s32 %s799_s16, %s1039_s20 }
  0x15   : > { %s42_s24 = scalar_select %p41_p4, %s1039_s20, 1 }
  0x16   : > { %p884_p8 = por %p60_p7, %p59_p5  ;;  %p102_p9 = scmp.eq.s32.totalorder %s101_s26, 0 }
  0x17   : > { %s43_s27 = ssub.s32 %s870_s22, %s42_s24  ;;  %s104_s28 = sadd.s32 1, %s779_s11 }
  0x18   : > { %p44_p10 = scmp.eq.s32.totalorder %s43_s27, 0  ;;  %p114_p11 = scmp.ne.s32.totalorder %s779_s11, %s775_s10 }
  0x19   : > { %s893_s29 = scalar_select %p102_p9, %s779_s11, %s104_s28  }
  0x1a   : > { %s896_s30 = scalar_select %p44_p10, %s791_s14, %s46_s21  }
  0x1b   : > { %p115_p12 = scmp.eq.s32.totalorder %s518_s18, 1  ;;  %p120_p13 = scmp.ne.s32.totalorder %s775_s10, %s771_s9 }
  0x1c   : > { %p121_p0 = scmp.eq.s32.totalorder %s519_s19, 1  ;;  %p521_p2 = scmp.ge.s32.totalorder %s803_s17, 2 }
  0x1d   : > { %p902_p1 = por %p115_p12, %p114_p11  ;;  %p558_p4 = scmp.lt.s32.totalorder %s803_s17, 2 }
  0x1e   : > { %p907_p3 = por %p121_p0, %p120_p13  ;;  %s141_s5 = sand.u32 1, %s791_s14  }
  0x1f   : > { %s539_s6 = sshll.u32 %s870_s22, 5  ;;  %s522_s7 = sshll.u32 %s141_s5, 5 }
  0x20   : > { %s1027_s0 = sld [smem:[#allocation14_spill]]  ;;  %s145_s19 = scalar_lea.vmem [#allocation3], %s522_s7 }
  0x21   : > { %s157_s24 = sshll.u32 %s145_s19, 4  ;;  %p548_p5 = pnand %p558_p4, %p879_p6  ;;  %s158_s24 = int_to_ptr.vmem [resolvable:$true] %s157_s24 }
  0x22   : > { %p528_p7 = scmp.ge.s32.totalorder %s803_s17, 1  ;;  %p185_p9 = scmp.lt.s32.totalorder %s803_s17, 3 }
  0x23   : > { %s142_s26 = scalar_lea.sflag [#allocation4], %s141_s5  ;;  %s176_s22 = scalar_lea.hbm %s1016_s1, %s539_s6 }
  0x24   : > { %p186_p10 = pnand %p528_p7, %p185_p9  ;;  %s178_s20 = sshll.u32 %s176_s22, 4  ;;  %s179_s20 = int_to_ptr.hbm [resolvable:$true] %s178_s20 }
  0x25   : > { %s168_s16 = scalar_lea.vmem [#allocation6], %s522_s7  ;;  %s165_s12 = scalar_lea.sflag [#allocation7], %s141_s5 }
  0x26   : > { %s153_s18 = scalar_lea.hbm %s1027_s0, %s539_s6  ;;  %s180_s8 = sshll.u32 %s168_s16, 4  ;;  %s181_s8 = int_to_ptr.vmem [resolvable:$true] %s180_s8 }
  0x27   : > { %s155_s21 = sshll.u32 %s153_s18, 4  ;;  %189 = sbr.rel (%p186_p10) target bundleno = 123 (0x7b), region = 28  ;;  %s156_s21 = int_to_ptr.hbm [resolvable:$true] %s155_s21 }
  0x28   : > { %550 = dma.hbm_to_vmem [thread:$0]  (!%p548_p5), %s156_s21, 512, %s158_s24, %s142_s26  }
  0x29   : > { %553 = dma.hbm_to_vmem [thread:$0]  (!%p548_p5), %s179_s20, 512, %s181_s8, %s165_s12  }
  0x2a   : > { %s191_s23 = sand.u32 (!%p186_p10), 1, %s787_s13  }
  0x2b   : > { %s529_s18 = sshll.u32 (!%p186_p10), %s191_s23, 5  ;;  %s192_s19 = scalar_lea.sflag (!%p186_p10), [#allocation4], %s191_s23 }
  0x2c   : > { %s195_s0 = scalar_lea.vmem [#allocation3], %s529_s18 }
  0x2d   : > { %758 = dma.done.wait (%p884_p8), %s192_s19, 512  }
  0x2e   : > { %760 = vsyncadd (%p884_p8), %s192_s19, 4294966784  ;;  %s202_s6 = scalar_lea.sflag [#allocation7], %s191_s23  ;;  %s205_s7 = scalar_lea.vmem [#allocation6], %s529_s18 }
  0x2f   : > { %762 = dma.done.wait (%p884_p8), %s202_s6, 512  }
  0x30   : > { %764 = vsyncadd (%p884_p8), %s202_s6, 4294966784  ;;  %s229_s16 = sand.u32 1, %s775_s10   ;;  %v242_v0 = vlaneseq  ;;  %s532_s20 = sshll.u32 %s795_s15, 3  ;;  %v805_v2 = vmov 0.0   ;;  %v247_v3 = vld [vmem:[%s195_s0] sm:$0xff]  ;;  %v248_v4 = vld [vmem:[%s195_s0 + $0x8] sm:$0xff] }
  0x31   : > { %s937_s5 = sshll.u32 %s229_s16, 2  ;;  %s939_s21 = ssub.s32 15, %s532_s20  ;;  %v249_v5 = vld [vmem:[%s195_s0 + $0x10] sm:$0xff]  ;;  %v250_v6 = vld [vmem:[%s195_s0 + $0x18] sm:$0xff]  ;;  %v251_v7 = vld [vmem:[%s205_s7] sm:$0xff] }
  0x32   : > { %vm942_vm0 = vcmp.lt.s32.totalorder %v242_v0, 512  ;;  %v252_v8 = vld [vmem:[%s205_s7 + $0x8] sm:$0xff]  ;;  %v271_v9 = vand.u32 2147483647, %v247_v3  ;;  %v253_v10 = vld [vmem:[%s205_s7 + $0x10] sm:$0xff]  ;;  %v254_v11 = vld [vmem:[%s205_s7 + $0x18] sm:$0xff]  ;;  %v255_v12 = vsub.f32 %v247_v3, %v251_v7 }
  0x33   : > { %246 = vst.msk [vmem:[#allocation2] sm:$0xf] %vm942_vm0, %v805_v2  ;;  %v256_v13 = vsub.f32 %v248_v4, %v252_v8  ;;  %vm259_vm1 = vcmp.ge.f32.partialorder %v251_v7, 1.0  ;;  %vm260_vm2 = vcmp.ge.f32.partialorder %v252_v8, 1.0  ;;  %v257_v14 = vsub.f32 %v249_v5, %v253_v10  ;;  %s231_s0 = scalar_lea.vmem [#allocation8], %s937_s5  ;;  %p533_p6 = scmp.lt.s32.totalorder %s939_s21, 8 }
  0x34   : > { %v258_v15 = vsub.f32 %v250_v6, %v254_v11  ;;  %vm261_vm3 = vcmp.ge.f32.partialorder %v253_v10, 1.0  ;;  %vm262_vm4 = vcmp.ge.f32.partialorder %v254_v11, 1.0  ;;  %v263_v16 = vmul.f32 %v255_v12, %v255_v12 }
  0x35   : > { %v264_v17 = vmul.f32 %v256_v13, %v256_v13  ;;  %vm267_vm5 = vcmp.eq.f32.partialorder %v251_v7, 0.0  ;;  %vm268_vm6 = vcmp.eq.f32.partialorder %v252_v8, 0.0  ;;  %v265_v18 = vmul.f32 %v257_v14, %v257_v14 }
  0x36   : > { %v266_v19 = vmul.f32 %v258_v15, %v258_v15  ;;  %vm269_vm7 = vcmp.eq.f32.partialorder %v253_v10, 0.0  ;;  %vm270_vm8 = vcmp.eq.f32.partialorder %v254_v11, 0.0  ;;  %v272_v20 = vand.u32 2147483647, %v248_v4  ;;  %289 = sbr.rel (%p533_p6) target bundleno = 78 (0x4e), region = 44 }
  0x37   : > { %v273_v21 = vand.u32 2147483647, %v249_v5  ;;  %v274_v22 = vand.u32 2147483647, %v250_v6  ;;  %v275_v23 = vsel %vm267_vm5, %v271_v9, 0.0 }
  0x38   : > { %v276_v24 = vsel %vm268_vm6, %v272_v20, 0.0  ;;  %v279_v27 = vsel %vm259_vm1, %v263_v16, %v275_v23 }
  0x39   : > { %v277_v25 = vsel %vm269_vm7, %v273_v21, 0.0  ;;  %v278_v26 = vsel %vm270_vm8, %v274_v22, 0.0  ;;  %v280_v28 = vsel %vm260_vm2, %v264_v17, %v276_v24 }
  0x3a   : > { %v281_v29 = vsel %vm261_vm3, %v265_v18, %v277_v25  ;;  %v282_v30 = vsel %vm262_vm4, %v266_v19, %v278_v26 }
  0x3b   : > { %v291_v31 = vrot.slane %v279_v27, 4  ;;  %v297_v32 = vrot.slane %v280_v28, 4  ;;  %v303_v33 = vrot.slane %v281_v29, 4  ;;  %v309_v34 = vrot.slane %v282_v30, 4  ;;  %v290_v58 = vld [vmem:[#allocation2] sm:$0xf] }
  0x3c   : > { %vm322_vm9 = vcmask 1040384   ;;  %vm324_vm10 = vcmask 1042434   ;;  %vm326_vm11 = vcmask 1041408  }
  0x3d   : > { %v292_v35 = vadd.f32 %v291_v31, %v279_v27  ;;  %v298_v36 = vadd.f32 %v297_v32, %v280_v28  ;;  %v304_v37 = vadd.f32 %v303_v33, %v281_v29  ;;  %v310_v38 = vadd.f32 %v309_v34, %v282_v30 }
  0x3f   : > { %v293_v39 = vrot.slane %v292_v35, 2  ;;  %v299_v40 = vrot.slane %v298_v36, 2  ;;  %v305_v41 = vrot.slane %v304_v37, 2  ;;  %v311_v42 = vrot.slane %v310_v38, 2 }
  0x41   : > { %v294_v43 = vadd.f32 %v293_v39, %v292_v35  ;;  %v300_v44 = vadd.f32 %v299_v40, %v298_v36  ;;  %v306_v45 = vadd.f32 %v305_v41, %v304_v37  ;;  %v312_v46 = vadd.f32 %v311_v42, %v310_v38 }
  0x43   : > { %v295_v47 = vrot.slane %v294_v43, 1  ;;  %v301_v48 = vrot.slane %v300_v44, 1  ;;  %v307_v49 = vrot.slane %v306_v45, 1  ;;  %v313_v50 = vrot.slane %v312_v46, 1 }
  0x45   : > { %v296_v51 = vadd.f32 %v295_v47, %v294_v43  ;;  %v302_v52 = vadd.f32 %v301_v48, %v300_v44  ;;  %v308_v53 = vadd.f32 %v307_v49, %v306_v45  ;;  %v314_v54 = vadd.f32 %v313_v50, %v312_v46 }
  0x47   : > { %v319_v55 = vrot.slane %v302_v52, 7  ;;  %v320_v56 = vrot.slane %v308_v53, 6  ;;  %v321_v57 = vrot.slane %v314_v54, 5 }
  0x49   : > { %v323_v59 = vsel %vm322_vm9, %v296_v51, %v319_v55  ;;  %v325_v60 = vsel %vm324_vm10, %v320_v56, %v321_v57 }
  0x4a   : > { %v327_v61 = vsel %vm326_vm11, %v323_v59, %v325_v60 }
  0x4b   : > { %v329_v62 = vadd.f32 %v327_v61, %v290_v58 }
  0x4d   : > { %334 = vst.msk [vmem:[#allocation2] sm:$0xf] %vm942_vm0, %v329_v62 }
  0x4e PF: > { %p534_p8 = scmp.ge.s32.totalorder %s939_s21, 8 }
  0x50   : > { %338 = sbr.rel (%p534_p8) target bundleno = 108 (0x6c), region = 48 }
  0x55   : > { %v340_v63 = vshrl.u32 %v242_v0, 7  ;;  %v341_v2 = vstv %s939_s21  ;;  %vm379_vm13 = vcmask 1040384   ;;  %vm381_vm14 = vcmask 1042434   ;;  %v347_v33 = vld [vmem:[#allocation2] sm:$0xf] }
  0x56   : > { %vm383_vm15 = vcmask 1041408  }
  0x57   : > { %vm342_vm12 = vcmp.lt.s32.totalorder %v340_v63, %v341_v2 }
  0x58   : > { %v343_v3 = vsel %vm342_vm12, %v279_v27, 0.0  ;;  %v344_v4 = vsel %vm342_vm12, %v280_v28, 0.0  ;;  %v345_v5 = vsel %vm342_vm12, %v281_v29, 0.0  ;;  %v346_v6 = vsel %vm342_vm12, %v282_v30, 0.0 }
  0x59   : > { %v348_v7 = vrot.slane %v343_v3, 4  ;;  %v354_v8 = vrot.slane %v344_v4, 4  ;;  %v360_v9 = vrot.slane %v345_v5, 4  ;;  %v366_v10 = vrot.slane %v346_v6, 4 }
  0x5b   : > { %v349_v11 = vadd.f32 %v348_v7, %v343_v3  ;;  %v355_v12 = vadd.f32 %v354_v8, %v344_v4  ;;  %v361_v13 = vadd.f32 %v360_v9, %v345_v5  ;;  %v367_v14 = vadd.f32 %v366_v10, %v346_v6 }
  0x5d   : > { %v350_v15 = vrot.slane %v349_v11, 2  ;;  %v356_v16 = vrot.slane %v355_v12, 2  ;;  %v362_v17 = vrot.slane %v361_v13, 2  ;;  %v368_v18 = vrot.slane %v367_v14, 2 }
  0x5f   : > { %v351_v19 = vadd.f32 %v350_v15, %v349_v11  ;;  %v357_v0 = vadd.f32 %v356_v16, %v355_v12  ;;  %v363_v20 = vadd.f32 %v362_v17, %v361_v13  ;;  %v369_v21 = vadd.f32 %v368_v18, %v367_v14 }
  0x61   : > { %v352_v22 = vrot.slane %v351_v19, 1  ;;  %v358_v23 = vrot.slane %v357_v0, 1  ;;  %v364_v24 = vrot.slane %v363_v20, 1  ;;  %v370_v25 = vrot.slane %v369_v21, 1 }
  0x63   : > { %v353_v26 = vadd.f32 %v352_v22, %v351_v19  ;;  %v359_v27 = vadd.f32 %v358_v23, %v357_v0  ;;  %v365_v28 = vadd.f32 %v364_v24, %v363_v20  ;;  %v371_v29 = vadd.f32 %v370_v25, %v369_v21 }
  0x65   : > { %v376_v30 = vrot.slane %v359_v27, 7  ;;  %v377_v31 = vrot.slane %v365_v28, 6  ;;  %v378_v32 = vrot.slane %v371_v29, 5 }
  0x67   : > { %v380_v34 = vsel %vm379_vm13, %v353_v26, %v376_v30  ;;  %v382_v35 = vsel %vm381_vm14, %v377_v31, %v378_v32 }
  0x68   : > { %v384_v36 = vsel %vm383_vm15, %v380_v34, %v382_v35 }
  0x69   : > { %v386_v37 = vadd.f32 %v384_v36, %v347_v33 }
  0x6b   : > { %391 = vst.msk [vmem:[#allocation2] sm:$0xf] %vm942_vm0, %v386_v37 }
  0x6c PF: > { %s536_s25 = sshll.u32 %s795_s15, 2  ;;  %s414_s28 = sshll.u32 %s231_s0, 4  ;;  %s415_s28 = int_to_ptr.vmem [resolvable:$true] %s414_s28 }
  0x6d   : > { %s412_s27 = scalar_lea.hbm %s1017_s2, %s536_s25  ;;  %s402_s8 = scalar_lea.sflag [#allocation5], %s229_s16 }
  0x6e   : > { %s416_s22 = sshll.u32 %s412_s27, 4  ;;  %s713_s19 = scalar_lea.hbm %s1017_s2, 8  ;;  %s417_s22 = int_to_ptr.hbm [resolvable:$true] %s416_s22 }
  0x6f   : > { %s707_s12 = sshra.s32 %s417_s22, 4  ;;  %s708_s12 = int_to_ptr.hbm [resolvable:$true] %s707_s12 }
  0x70   : > { %s709_s23 = scalar_lea.hbm %s708_s12, 4  ;;  %p714_p0 = scmp.lt.s32.totalorder %s708_s12, %s1017_s2 }
  0x71   : > { %p710_p11 = scmp.ne.s32.totalorder %s708_s12, %s709_s23  ;;  %p715_p4 = scmp.lt.s32.totalorder %s713_s19, %s709_s23 }
  0x72   : > { %v395_v38 = vld [vmem:[#allocation2] sm:$0xf] }
  0x73   : > { %400 = vst.msk [vmem:[%s231_s0] sm:$0xf] %vm942_vm0, %v395_v38  ;;  %p711_p12 = pnand %p710_p11, %p902_p1  ;;  %p716_p5 = por %p715_p4, %p714_p0 }
  0x75   : > { %p712_p13 = pneg %p711_p12 }
  0x77   : > { %p717_p7 = pnand %p716_p5, %p712_p13 }
  0x79   : > { %720 = shalt.err (!%p717_p7)
}
  0x7a   : > { %545 = dma.vmem_to_hbm [thread:$0]  (%p902_p1), %s415_s28, 64, %s417_s22, %s402_s8  }
  0x7b PF: > { %s428_s16 = sand.u32 1, %s771_s9   ;;  %p555_p9 = pnand %p521_p2, %p907_p3 }
  0x7c   : > { %s429_s20 = scalar_lea.sflag [#allocation5], %s428_s16 }
  0x7d   : > { %p556_p10 = pneg %p555_p9 }
  0x7f   : > { %766 = dma.done.wait (%p556_p10), %s429_s20, 64  }
  0x80   : > { %768 = vsyncadd (%p556_p10), %s429_s20, 4294967232  ;;  %s21_s17 = sadd.s32 1, %s803_s17   ;;  %s1030_s15 = sld [smem:[#allocation12_spill]] }
  0x81   : > { %p18_p6 = scmp.ge.s32.totalorder %s21_s17, 4   ;;  %s1031_s16 = sld [smem:[#allocation13_spill]] }
  0x82   : > { %s1032_s9 = smov %s775_s10  ;;  %s1033_s10 = smov %s779_s11 }
  0x83   : > { %s1034_s11 = smov %s893_s29  ;;  %s1035_s12 = smov %s787_s13 }
  0x84   : > { %s1036_s13 = smov %s791_s14  ;;  %s1037_s14 = smov %s896_s30 }
  0x85   :  { %20 = sbr.rel (!%p18_p6) target bundleno = 12 (0xc), region = 102 }
  0x8a   :  { %435 = vsyncpa [#allocation4], 1 }
  0x8b   :  { %437 = vsyncpa [#allocation4 + $0x1], 1 }
  0x8c   :  { %438 = vsyncpa [#allocation7], 1 }
  0x8d   :  { %440 = vsyncpa [#allocation7 + $0x1], 1 }
  0x8e   :  { %441 = vsyncpa [#allocation5], 1 }
  0x8f   :  { %443 = vsyncpa [#allocation5 + $0x1], 1 }

</bundles_post_ra>
